<compile_context>
chip_gen: v7x
topology: tpu7x:2x2x1
jax: 0.10.0
libtpu: 0.0.40
codegen_flags: <defaults>
</compile_context>

<pallas_src>
import functools

import jax
import jax.numpy as jnp
from jax.experimental import pallas as pl
from jax.experimental.pallas import tpu as pltpu


def _rmsnorm_kernel(x_ref, w_ref, o_ref, *, eps, inv_h, cast_before_scale,
                    scale_in_f32):
    # x_ref: (tm, H) tile of hidden_states (original dtype)
    # w_ref: (1, H) weight row (broadcast over rows)
    # o_ref: (tm, H) output tile
    x_f32 = x_ref[...].astype(jnp.float32)
    # variance = mean(x^2) over hidden dim, in float32 (matches .to(float32))
    variance = jnp.sum(x_f32 * x_f32, axis=-1, keepdims=True) * inv_h
    inv_rms = jax.lax.rsqrt(variance + eps)
    # hidden_states * rsqrt(var + eps): promotes to f32 (torch semantics).
    y = x_f32 * inv_rms
    if cast_before_scale and not scale_in_f32:
        # torch bit-exact path: cast to weight dtype (fp16/bf16), then multiply
        # in that dtype. Product is already o_ref.dtype -> no extra cast.
        o_ref[...] = w_ref[...] * y.astype(o_ref.dtype)
    else:
        # fp32 weight path, or opt-in fast path: multiply in f32, single cast.
        o_ref[...] = (w_ref[...].astype(jnp.float32) * y).astype(o_ref.dtype)


def _round_up(x, m):
    return ((x + m - 1) // m) * m


def _vmem_capacity_bytes():
    """Physical VMEM capacity per TensorCore (generation-aware, with fallback)."""
    try:
        return int(pltpu.get_tpu_info().vmem_capacity_bytes)
    except Exception:
        # Conservative fallback (v7x per-TC VMEM).
        return 64 * 1024 * 1024


def llama_rmsnorm(hidden_states, weight, eps=1e-6, *, row_tile=None,
                  scale_in_f32=False):
    """hidden_states: (..., hidden_size); weight: (hidden_size,)."""
    orig_shape = hidden_states.shape
    hidden_size = orig_shape[-1]
    x2d = hidden_states.reshape(-1, hidden_size)
    rows = x2d.shape[0]

    # Output dtype, following the module's forward:
    #   - weight in {fp16, bf16} -> hidden_states cast to weight dtype before
    #     the final multiply -> output is weight dtype.
    #   - otherwise (fp32 weight) -> output is float32 (f32 promotion).
    cast_before_scale = weight.dtype in (jnp.float16, jnp.bfloat16)
    out_dtype = weight.dtype if cast_before_scale else jnp.float32

    w2d = weight.reshape(1, hidden_size)

    in_bytes = jnp.dtype(x2d.dtype).itemsize
    out_bytes = jnp.dtype(out_dtype).itemsize
    w_bytes = jnp.dtype(weight.dtype).itemsize

    # Sublane packing: 2-byte dtypes pack 2 rows per sublane -> prefer tm % 16.
    row_align = 16 if min(in_bytes, out_bytes) < 4 else 8

    # Per-row VMEM cost, including in-kernel f32 temporaries (x_f32 + y live
    # across the reduction: ~8 bytes/elem) on top of the double-buffered I/O.
    bytes_per_row = hidden_size * (2 * (in_bytes + out_bytes) + 8)

    vmem_cap = _vmem_capacity_bytes()

    if row_tile is None:
        # ~1/3 of physical VMEM per generation (v5e/v6e: ~42 MiB, v7x: ~21 MiB).
        vmem_tile_budget = vmem_cap // 3
        tm = max(row_align, vmem_tile_budget // max(bytes_per_row, 1))
        tm = min(tm, 4096)
        # Keep >= ~4 grid steps on large problems: enough to pipeline on 1-TC
        # chips and to give each of v7x's 2 TensorCores >= 2 steps.
        min_steps = 4
        if rows >= min_steps * row_align:
            tm = min(tm, _round_up(pl.cdiv(rows, min_steps), row_align))
    else:
        tm = row_tile

    tm = max(row_align, (tm // row_align) * row_align)
    tm = min(tm, _round_up(rows, row_align))

    grid = (pl.cdiv(rows, tm),)  # Pallas masks the partial last block.

    # VMEM needed: double-buffered I/O tiles + f32 temps + weight, + headroom.
    needed = tm * hidden_size * (2 * (in_bytes + out_bytes) + 8) \
        + 2 * hidden_size * w_bytes
    vmem_limit = max(needed + (4 << 20), 32 * 1024 * 1024)
    vmem_limit = min(vmem_limit, int(0.9 * vmem_cap))
    vmem_limit = max(vmem_limit, needed + (1 << 20))

    out = pl.pallas_call(
        functools.partial(
            _rmsnorm_kernel,
            eps=float(eps),
            inv_h=1.0 / float(hidden_size),
            cast_before_scale=cast_before_scale,
            scale_in_f32=scale_in_f32,
        ),
        out_shape=jax.ShapeDtypeStruct((rows, hidden_size), out_dtype),
        grid_spec=pltpu.PrefetchScalarGridSpec(
            num_scalar_prefetch=0,
            grid=grid,
            in_specs=[
                pl.BlockSpec((tm, hidden_size), lambda i: (i, 0)),
                pl.BlockSpec((1, hidden_size), lambda i: (0, 0)),
            ],
            out_specs=pl.BlockSpec((tm, hidden_size), lambda i: (i, 0)),
        ),
        compiler_params=pltpu.CompilerParams(
            dimension_semantics=("parallel",),
            vmem_limit_bytes=int(vmem_limit),
        ),
    )(x2d, w2d)

    return out.reshape(orig_shape[:-1] + (hidden_size,))


def llama_rmsnorm_ref(hidden_states, weight, eps=1e-6):
    """Pure-JAX reference mirroring the PyTorch module's forward."""
    variance = jnp.mean(jnp.square(hidden_states.astype(jnp.float32)), axis=-1,
                        keepdims=True)
    hs = hidden_states.astype(jnp.float32) * jax.lax.rsqrt(variance + eps)
    if weight.dtype in (jnp.float16, jnp.bfloat16):
        hs = hs.astype(weight.dtype)
    return weight * hs


if __name__ == "__main__":
    key = jax.random.PRNGKey(0)

    # Test 1: fp32 input, fp32 weight (matches torch.ones(hidden_size) init).
    batch, seq, hidden = 2, 8, 128
    x = jax.random.normal(key, (batch, seq, hidden), dtype=jnp.float32)
    weight = jnp.ones((hidden,), dtype=jnp.float32)

    out = llama_rmsnorm(x, weight, eps=1e-6)
    out = jax.block_until_ready(out)
    ref = llama_rmsnorm_ref(x, weight, eps=1e-6)
    assert out.shape == x.shape, (out.shape, x.shape)
    assert out.dtype == ref.dtype, (out.dtype, ref.dtype)
    assert jnp.allclose(out, ref, atol=1e-5, rtol=1e-5), "fp32 mismatch vs reference"

    # Test 2: bf16 input + bf16 weight, non-divisible row count (edge-block path).
    k1, k2 = jax.random.split(key)
    x_bf = jax.random.normal(k1, (3, 5, 256), dtype=jnp.float32).astype(jnp.bfloat16)
    w_bf = (1.0 + 0.1 * jax.random.normal(k2, (256,), dtype=jnp.float32)).astype(jnp.bfloat16)

    out_bf = llama_rmsnorm(x_bf, w_bf, eps=1e-6)
    out_bf = jax.block_until_ready(out_bf)
    ref_bf = llama_rmsnorm_ref(x_bf, w_bf, eps=1e-6)
    assert out_bf.shape == x_bf.shape
    assert out_bf.dtype == jnp.bfloat16
    assert jnp.allclose(out_bf.astype(jnp.float32), ref_bf.astype(jnp.float32),
                        atol=2e-2, rtol=2e-2), "bf16 mismatch vs reference"

    # Test 3: bf16 path with the opt-in f32-multiply fast variant (v5e/v7x hint).
    out_bf_f32 = llama_rmsnorm(x_bf, w_bf, eps=1e-6, scale_in_f32=True)
    out_bf_f32 = jax.block_until_ready(out_bf_f32)
    assert out_bf_f32.dtype == jnp.bfloat16
    assert jnp.allclose(out_bf_f32.astype(jnp.float32), ref_bf.astype(jnp.float32),
                        atol=2e-2, rtol=2e-2), "bf16 (f32-scale) mismatch vs reference"

    print("KERNEL_OK")
</pallas_src>

<mosaic_0001>
module attributes {stable_mosaic.version = 11 : i64} {
  func.func @_rmsnorm_kernel(%arg0: i32, %arg1: memref<16x128xf32, #tpu.memory_space<vmem>>, %arg2: memref<1x128xf32, #tpu.memory_space<vmem>>, %arg3: memref<16x128xf32, #tpu.memory_space<vmem>>) attributes {dimension_semantics = [#tpu.dimension_semantics<parallel>], iteration_bounds = array<i64: 1>, scalar_prefetch = 0 : i64, scratch_operands = 0 : i64, tpu.core_type = #tpu.core_type<tc>, window_params = [{transform_indices = @transform_0, window_bounds = array<i64: 16, 128>}, {pipeline_mode = #tpu.pipeline_mode<synchronous>, transform_indices = @transform_1, window_bounds = array<i64: 1, 128>}, {transform_indices = @transform_2, window_bounds = array<i64: 16, 128>}]} {
    %c0 = arith.constant 0 : index
    %c0_0 = arith.constant 0 : index
    %0 = vector.load %arg1[%c0, %c0_0] : memref<16x128xf32, #tpu.memory_space<vmem>>, vector<16x128xf32>
    %1 = arith.mulf %0, %0 : vector<16x128xf32>
    %cst = arith.constant dense<0.000000e+00> : vector<16xf32>
    %2 = vector.multi_reduction <add>, %1, %cst [1] : vector<16x128xf32> to vector<16xf32>
    %3 = vector.shape_cast %2 : vector<16xf32> to vector<16x1xf32>
    %cst_1 = arith.constant 7.812500e-03 : f32
    %4 = vector.broadcast %cst_1 : f32 to vector<16x1xf32>
    %5 = arith.mulf %3, %4 : vector<16x1xf32>
    %cst_2 = arith.constant 9.99999997E-7 : f32
    %6 = vector.broadcast %cst_2 : f32 to vector<16x1xf32>
    %7 = arith.addf %5, %6 : vector<16x1xf32>
    %8 = math.rsqrt %7 : vector<16x1xf32>
    %9 = vector.broadcast %8 : vector<16x1xf32> to vector<16x128xf32>
    %10 = arith.mulf %0, %9 : vector<16x128xf32>
    %c0_3 = arith.constant 0 : index
    %c0_4 = arith.constant 0 : index
    %11 = vector.load %arg2[%c0_3, %c0_4] : memref<1x128xf32, #tpu.memory_space<vmem>>, vector<1x128xf32>
    %12 = vector.broadcast %11 : vector<1x128xf32> to vector<16x128xf32>
    %13 = arith.mulf %12, %10 : vector<16x128xf32>
    %c0_5 = arith.constant 0 : index
    %c0_6 = arith.constant 0 : index
    %14 = vector.load %arg3[%c0_5, %c0_6] : memref<16x128xf32, #tpu.memory_space<vmem>>, vector<16x128xf32>
    tpu.vector_store %arg3[%c0_5, %c0_6], %13 {strides = array<i32>} : memref<16x128xf32, #tpu.memory_space<vmem>>, vector<16x128xf32>,
    return
  }
  func.func @transform_0(%arg0: i32) -> (i32, i32) {
    %c0_i32 = arith.constant 0 : i32
    %c0_i32_0 = arith.constant 0 : i32
    return %arg0, %c0_i32 : i32, i32
  }
  func.func @transform_1(%arg0: i32) -> (i32, i32) {
    %c0_i32 = arith.constant 0 : i32
    %c0_i32_0 = arith.constant 0 : i32
    %c0_i32_1 = arith.constant 0 : i32
    return %c0_i32, %c0_i32_0 : i32, i32
  }
  func.func @transform_2(%arg0: i32) -> (i32, i32) {
    %c0_i32 = arith.constant 0 : i32
    %c0_i32_0 = arith.constant 0 : i32
    return %arg0, %c0_i32 : i32, i32
  }
}

</mosaic_0001>

<bundles_post_ra>
// kernel: tpu_custom_call.1
= control target key start
LH: loop header
LB: loop body
LE: loop exit
PB: predicated region body
PF: predicated region fallthrough
CT: control target
= control target key end

     0   :  { %7 = vsyncpa [#allocation3], 0  ;;  %s179_s0 = inlined_call_operand.hbm [shape: f32[16,128], index: 0, kind: input, shape index: {}]   ;;  %s180_s1 = inlined_call_operand.vmem [shape: f32[1,128], index: 1, kind: input, shape index: {}]   ;;  %s181_s2 = inlined_call_operand.hbm [shape: f32[16,128], index: 2, kind: output, shape index: {}]  }
   0x1   :  { %8 = vsyncpa [#allocation4], 0  ;;  %s127_s9 = smov [#allocation2]   ;;  %s79_s13 = scalar_lea.hbm %s179_s0, 256 }
   0x2   :  { %s14_s10 = sshll.u32 %s127_s9, 4  ;;  %p80_p0 = scmp.ne.s32.totalorder %s179_s0, %s79_s13  ;;  %s15_s10 = int_to_ptr.vmem [resolvable:$true] %s14_s10 }
   0x3   :  { %p83_p1 = scmp.lt.u32.totalorder %s79_s13, %s179_s0 }
   0x5   :  { %p85_p2 = pnand %p83_p1, %p80_p0 }
   0x7   :  { %88 = shalt.err (!%p85_p2)
}
   0x8   :  { %s89_s18 = scalar_lea.vmem %s15_s10, 256  ;;  %p94_p4 = scmp.lt.s32.totalorder %s15_s10, %s15_s10 }
   0x9   :  { %p90_p3 = scmp.ne.s32.totalorder %s15_s10, %s89_s18  ;;  %p95_p5 = scmp.lt.s32.totalorder %s89_s18, %s89_s18 }
   0xb   :  { %p96_p6 = por %p95_p5, %p94_p4 }
   0xd   :  { %p97_p7 = pnand %p96_p6, %p90_p3 }
   0xf   :  { %100 = shalt.err (!%p97_p7)
}
  0x10   :  { %s128_s19 = smov 128   ;;  %s129_s20 = smov 8  }
  0x11   :  { %20 = dma.hbm_to_vmem [thread:$0]  %s179_s0, 256, %s15_s10, [#allocation3], %s128_s19, %s128_s19, %s129_s20  }
  0x12   :  { %123 = dma.done.wait [#allocation3], 256  }
  0x13   :  { %124 = vsyncadd [#allocation3], 4294967040  ;;  %v26_v0 = vld [vmem:[#allocation2] sm:$0xff]  ;;  %v27_v1 = vld [vmem:[#allocation2 + $0x8] sm:$0xff]  ;;  %s130_s0 = smov [#allocation5]  }
  0x14   :  { %v28_v2 = vmul.f32 %v26_v0, %v26_v0  ;;  %v29_v3 = vmul.f32 %v27_v1, %v27_v1  ;;  %v70_v11 = vld [vmem:[%s180_s1] ss:$0 sm:$0xff]  ;;  %s58_s25 = sshll.u32 %s130_s0, 4  ;;  %s59_s25 = int_to_ptr.vmem [resolvable:$true] %s58_s25 }
  0x15   :  { %s101_s26 = scalar_lea.vmem %s59_s25, 256  ;;  %p106_p9 = scmp.lt.s32.totalorder %s59_s25, %s59_s25 }
  0x16   :  { %30 = vadd.xlane.f32.xlu0 %v28_v2  ;;  %p102_p8 = scmp.ne.s32.totalorder %s59_s25, %s101_s26  ;;  %p107_p10 = scmp.lt.s32.totalorder %s101_s26, %s101_s26 }
  0x18   :  { %p108_p11 = por %p107_p10, %p106_p9 }
  0x1a   :  { %32 = vadd.xlane.f32.xlu0 %v29_v3  ;;  %p109_p12 = pnand %p108_p11, %p102_p8 }
  0xa3   :  { %v31_v4 = vpop.xlane.xlu0 %30 }
  0xa4   :  { %v34_v5 = vmul.f32 0.0078125, %v31_v4 }
  0xa6   :  { %v36_v6 = vadd.f32 1e-06, %v34_v5 }
  0xa7   :  { %v33_v7 = vpop.xlane.xlu0 %32 }
  0xa8   :  { %75 = vrsqrt.f32 %v36_v6  ;;  %v35_v8 = vmul.f32 0.0078125, %v33_v7 }
  0xaa   :  { %v37_v9 = vadd.f32 1e-06, %v35_v8 }
  0xac   :  { %77 = vrsqrt.f32 %v37_v9 }
  0xb2   :  { %v76_v10 = vpop.eup %75 }
  0xb3   :  { %v40_v12 = vmul.f32 %v76_v10, %v26_v0 }
  0xb5   :  { %v49_v13 = vmul.f32 %v70_v11, %v40_v12 }
  0xb6   :  { %v78_v14 = vpop.eup %77 }
  0xb7   :  { %v41_v15 = vmul.f32 %v78_v14, %v27_v1  ;;  %51 = vst [vmem:[#allocation5] sm:$0xff] %v49_v13 }
  0xb9   :  { %v50_v16 = vmul.f32 %v70_v11, %v41_v15 }
  0xbb   :  { %52 = vst [vmem:[#allocation5 + $0x8] sm:$0xff] %v50_v16 }
  0xbc   :  { %112 = shalt.err (!%p109_p12)
}
  0xbd   :  { %s113_s1 = scalar_lea.hbm %s181_s2, 256 }
  0xbe   :  { %p114_p13 = scmp.ne.s32.totalorder %s181_s2, %s113_s1  ;;  %p117_p0 = scmp.lt.u32.totalorder %s113_s1, %s181_s2 }
  0xc0   :  { %p119_p1 = pnand %p117_p0, %p114_p13 }
  0xc2   :  { %122 = shalt.err (!%p119_p1)
}
  0xc3   :  { %64 = dma.vmem_to_hbm [thread:$0]  %s59_s25, 256, %s181_s2, [#allocation4], %s128_s19, %s128_s19, %s129_s20  }
  0xc4   :  { %125 = dma.done.wait [#allocation4], 256  }
  0xc5   :  { %126 = vsyncadd [#allocation4], 4294967040 }
  0xc6   :  { %68 = vsyncpa [#allocation3], 1 }
  0xc7   :  { %69 = vsyncpa [#allocation4], 1 }

</bundles_post_ra>
